<compile_context>
chip_gen: v7x
topology: tpu7x:2x2x1
jax: 0.10.0
libtpu: 0.0.40
codegen_flags: <defaults>
</compile_context>

<pallas_src>
import numpy as np
import jax
import jax.numpy as jnp
from jax.experimental import pallas as pl
from jax.experimental.pallas import tpu as pltpu


# ----------------------------------------------------------------------------- glue
def calculate_birds_eye_view_parameters(x_bounds, y_bounds, z_bounds):
    bev_resolution = np.array([row[2] for row in [x_bounds, y_bounds, z_bounds]],
                              dtype=np.float64)
    bev_start_position = np.array([row[0] + row[2] / 2.0
                                   for row in [x_bounds, y_bounds, z_bounds]],
                                  dtype=np.float64)
    bev_dimension = np.array([round((row[1] - row[0]) / row[2])
                              for row in [x_bounds, y_bounds, z_bounds]],
                             dtype=np.int64)
    return bev_resolution, bev_start_position, bev_dimension


def make_norm_coords(grid_conf, map_grid_conf):
    _, bev_start, _ = calculate_birds_eye_view_parameters(
        grid_conf['xbound'], grid_conf['ybound'], grid_conf['zbound'])
    m_res, m_start, m_dim = calculate_birds_eye_view_parameters(
        map_grid_conf['xbound'], map_grid_conf['ybound'], map_grid_conf['zbound'])
    # Count derived from bev_dimension (robust to float arange rounding); coordinate
    # values match torch.arange(start, stop, step).
    nx, ny = int(m_dim[0]), int(m_dim[1])
    map_x = m_start[0] + np.arange(nx, dtype=np.float64) * m_res[0]
    map_y = m_start[1] + np.arange(ny, dtype=np.float64) * m_res[1]
    norm_map_x = map_x / (-bev_start[0])   # grid[..., 0]  (input width / last dim)
    norm_map_y = map_y / (-bev_start[1])   # grid[..., 1]  (input height)
    return norm_map_x.astype(np.float32), norm_map_y.astype(np.float32)


def bilinear_weight_matrix(coords, in_size):
    """Row i holds the 1-D bilinear weights (align_corners=True, zeros padding — the
    flags the PyTorch module passes) for normalized coord coords[i] over in_size."""
    pos = (coords.astype(np.float64) + 1.0) * 0.5 * (in_size - 1)
    i0 = np.floor(pos)
    i1 = i0 + 1.0
    w1 = pos - i0
    w0 = 1.0 - w1
    idx = np.arange(in_size, dtype=np.float64)
    W = (w0[:, None] * (idx[None, :] == i0[:, None]).astype(np.float64)
         + w1[:, None] * (idx[None, :] == i1[:, None]).astype(np.float64))
    return W.astype(np.float32)   # (N_out, in_size); out-of-bound taps are zero


# ------------------------------------------------------------------- weight caching
_WEIGHT_CACHE = {}


def _conf_key(conf):
    return tuple(tuple(float(v) for v in conf[k]) for k in ('xbound', 'ybound', 'zbound'))


def _get_weights(grid_conf, map_grid_conf, h_in, w_in):
    key = (_conf_key(grid_conf), _conf_key(map_grid_conf), int(h_in), int(w_in))
    hit = _WEIGHT_CACHE.get(key)
    if hit is None:
        nmx, nmy = make_norm_coords(grid_conf, map_grid_conf)
        Wy = bilinear_weight_matrix(nmy, h_in)                       # (H_out, H_in)
        Wx = bilinear_weight_matrix(nmx, w_in)                       # (W_out, W_in)
        hit = (jnp.asarray(Wy), jnp.asarray(np.ascontiguousarray(Wx.T)))
        _WEIGHT_CACHE[key] = hit
    return hit


# --------------------------------------------------------------------------- tiling
_MAX_UNROLL = 64  # hard cap on channels per grid step (keeps the static unroll small)


def _vmem_budgets():
    """(per-step in+out block byte budget, vmem_limit cap, physical VMEM)."""
    try:
        phys = int(pltpu.get_tpu_info().vmem_capacity_bytes)
    except Exception:
        phys = 64 << 20                      # conservative fallback (v7x-sized)
    if phys >= (96 << 20):                   # v5e / v6e: 128 MiB VMEM, lower HBM BW
        return 32 << 20, 96 << 20, phys
    return 16 << 20, 40 << 20, phys          # v7x: 64 MiB VMEM, 3.2 TB/s HBM


def _choose_channel_tile(bc, per_ch_bytes, dma_budget):
    """Channels per grid step: as large as the per-step DMA budget allows, capped so
    the in-kernel unroll stays small and the grid keeps >= 2 parallel steps (so both
    v7x TensorCores get work) whenever there are >= 2 channels."""
    tc = max(1, dma_budget // max(per_ch_bytes, 1))
    tc = min(tc, _MAX_UNROLL)
    if bc >= 2:
        tc = min(tc, (bc + 1) // 2)
    return int(max(1, min(tc, bc)))


# ----------------------------------------------------------------------------- kernel
def _slice_kernel(wy_ref, wxt_ref, x_ref, o_ref):
    # wy_ref : (H_out, H_in)        grid-invariant row (height) bilinear weights
    # wxt_ref: (W_in, W_out)        grid-invariant col (width) bilinear weights, Wx^T
    # x_ref  : (TC, H_in, W_in)     channel tile in native NCHW layout
    # o_ref  : (TC, H_out, W_out)
    wy = wy_ref[...]
    wxt = wxt_ref[...]
    for c in range(x_ref.shape[0]):      # TC <= 64: static unroll of tiny dots
        t = jnp.dot(wy, x_ref[c], preferred_element_type=jnp.float32)   # (H_out, W_in)
        o = jnp.dot(t, wxt, preferred_element_type=jnp.float32)         # (H_out, W_out)
        o_ref[c] = o.astype(o_ref.dtype)


# ----------------------------------------------------------------------------- wrapper
def bev_feature_slicer(x, grid_conf, map_grid_conf):
    if grid_conf == map_grid_conf:
        return x  # identity-mapping branch (matches the PyTorch module)

    B, C, H_in, W_in = x.shape
    wy, wxt = _get_weights(grid_conf, map_grid_conf, H_in, W_in)
    H_out, W_out = int(wy.shape[0]), int(wxt.shape[1])

    BC = B * C
    itemsize = int(np.dtype(x.dtype).itemsize)
    dma_budget, vmem_cap_limit, vmem_phys = _vmem_budgets()

    per_ch_bytes = (H_in * W_in + H_out * W_out) * itemsize
    TC = _choose_channel_tile(BC, per_ch_bytes, dma_budget)
    n_blocks = pl.cdiv(BC, TC)

    # Leading-dim merge only — no HBM transpose / relayout.
    x3 = x.reshape(BC, H_in, W_in)

    # Explicit VMEM budget: double-buffered in+out blocks + weights + headroom.
    blk_bytes = TC * per_ch_bytes
    w_bytes = (H_out * H_in + W_in * W_out) * 4
    needed = 2 * blk_bytes + 2 * w_bytes + (4 << 20)
    vmem_limit = int(min(max(needed, 8 << 20), vmem_cap_limit))
    if needed > vmem_limit:  # degenerate huge single-channel slab: use physical VMEM
        vmem_limit = int(min(needed, vmem_phys - (2 << 20)))

    out3 = pl.pallas_call(
        _slice_kernel,
        out_shape=jax.ShapeDtypeStruct((BC, H_out, W_out), x.dtype),
        grid_spec=pltpu.PrefetchScalarGridSpec(
            num_scalar_prefetch=0,
            grid=(n_blocks,),
            in_specs=[
                pl.BlockSpec((H_out, H_in), lambda n: (0, 0)),        # Wy (invariant)
                pl.BlockSpec((W_in, W_out), lambda n: (0, 0)),        # Wx^T (invariant)
                pl.BlockSpec((TC, H_in, W_in), lambda n: (n, 0, 0)),  # x channel tile
            ],
            out_specs=pl.BlockSpec((TC, H_out, W_out), lambda n: (n, 0, 0)),
        ),
        compiler_params=pltpu.CompilerParams(
            dimension_semantics=("parallel",),
            vmem_limit_bytes=vmem_limit,
        ),
    )(wy, wxt, x3)

    return out3.reshape(B, C, H_out, W_out)


# ----------------------------------------------------------------------------- main
if __name__ == "__main__":
    # 16x16 source BEV, resliced to an 8x8 map window.
    grid_conf = {'xbound': [-8.0, 8.0, 1.0],
                 'ybound': [-8.0, 8.0, 1.0],
                 'zbound': [-5.0, 3.0, 8.0]}
    map_grid_conf = {'xbound': [-4.0, 4.0, 1.0],
                     'ybound': [-4.0, 4.0, 1.0],
                     'zbound': [-5.0, 3.0, 8.0]}

    key = jax.random.PRNGKey(0)
    x = jax.random.normal(key, (2, 4, 16, 16), dtype=jnp.float32)  # NCHW

    out = bev_feature_slicer(x, grid_conf, map_grid_conf)
    out = jax.block_until_ready(out)

    # Reference: same separable bilinear map evaluated with a plain einsum.
    nmx, nmy = make_norm_coords(grid_conf, map_grid_conf)
    Wy_ref = jnp.asarray(bilinear_weight_matrix(nmy, x.shape[2]))
    Wx_ref = jnp.asarray(bilinear_weight_matrix(nmx, x.shape[3]))
    ref = jnp.einsum('oh,bchw,pw->bcop', Wy_ref, x, Wx_ref,
                     precision=jax.lax.Precision.HIGHEST)

    assert out.shape == (2, 4, 8, 8)
    assert jnp.allclose(out, ref, atol=1e-5, rtol=1e-5)

    # identity-mapping branch
    same = bev_feature_slicer(x, grid_conf, grid_conf)
    assert same is x

    print("KERNEL_OK")
</pallas_src>

<mosaic_0001>
module attributes {stable_mosaic.version = 11 : i64} {
  func.func @_slice_kernel(%arg0: i32, %arg1: memref<8x16xf32, #tpu.memory_space<vmem>>, %arg2: memref<16x8xf32, #tpu.memory_space<vmem>>, %arg3: memref<4x16x16xf32, #tpu.memory_space<vmem>>, %arg4: memref<4x8x8xf32, #tpu.memory_space<vmem>>) attributes {dimension_semantics = [#tpu.dimension_semantics<parallel>], iteration_bounds = array<i64: 2>, scalar_prefetch = 0 : i64, scratch_operands = 0 : i64, tpu.core_type = #tpu.core_type<tc>, window_params = [{pipeline_mode = #tpu.pipeline_mode<synchronous>, transform_indices = @transform_0, window_bounds = array<i64: 8, 16>}, {pipeline_mode = #tpu.pipeline_mode<synchronous>, transform_indices = @transform_1, window_bounds = array<i64: 16, 8>}, {transform_indices = @transform_2, window_bounds = array<i64: 4, 16, 16>}, {transform_indices = @transform_3, window_bounds = array<i64: 4, 8, 8>}]} {
    %c0 = arith.constant 0 : index
    %c0_0 = arith.constant 0 : index
    %0 = vector.load %arg1[%c0, %c0_0] : memref<8x16xf32, #tpu.memory_space<vmem>>, vector<8x16xf32>
    %c0_1 = arith.constant 0 : index
    %c0_2 = arith.constant 0 : index
    %1 = vector.load %arg2[%c0_1, %c0_2] : memref<16x8xf32, #tpu.memory_space<vmem>>, vector<16x8xf32>
    %c0_3 = arith.constant 0 : index
    %c0_4 = arith.constant 0 : index
    %c0_5 = arith.constant 0 : index
    %2 = vector.load %arg3[%c0_3, %c0_4, %c0_5] : memref<4x16x16xf32, #tpu.memory_space<vmem>>, vector<1x16x16xf32>
    %3 = vector.shape_cast %2 : vector<1x16x16xf32> to vector<16x16xf32>
    %cst = arith.constant dense<0.000000e+00> : vector<8x16xf32>
    %4 = tpu.matmul %0, %3, %cst {dimension_numbers = #tpu.dot_dimension_numbers<[1], [0], [0], [1], [0, 0, 1, 1], [], []>} : vector<8x16xf32>, vector<16x16xf32>, vector<8x16xf32> -> vector<8x16xf32>
    %cst_6 = arith.constant dense<0.000000e+00> : vector<8x8xf32>
    %5 = tpu.matmul %4, %1, %cst_6 {dimension_numbers = #tpu.dot_dimension_numbers<[1], [0], [0], [1], [0, 0, 1, 1], [], []>} : vector<8x16xf32>, vector<16x8xf32>, vector<8x8xf32> -> vector<8x8xf32>
    %c0_7 = arith.constant 0 : index
    %c0_8 = arith.constant 0 : index
    %c0_9 = arith.constant 0 : index
    %6 = vector.load %arg4[%c0_7, %c0_8, %c0_9] : memref<4x8x8xf32, #tpu.memory_space<vmem>>, vector<1x8x8xf32>
    %7 = vector.shape_cast %6 : vector<1x8x8xf32> to vector<8x8xf32>
    %8 = vector.shape_cast %5 : vector<8x8xf32> to vector<1x8x8xf32>
    tpu.vector_store %arg4[%c0_7, %c0_8, %c0_9], %8 {strides = array<i32>} : memref<4x8x8xf32, #tpu.memory_space<vmem>>, vector<1x8x8xf32>,
    %c1 = arith.constant 1 : index
    %c0_10 = arith.constant 0 : index
    %c0_11 = arith.constant 0 : index
    %9 = vector.load %arg3[%c1, %c0_10, %c0_11] : memref<4x16x16xf32, #tpu.memory_space<vmem>>, vector<1x16x16xf32>
    %10 = vector.shape_cast %9 : vector<1x16x16xf32> to vector<16x16xf32>
    %cst_12 = arith.constant dense<0.000000e+00> : vector<8x16xf32>
    %11 = tpu.matmul %0, %10, %cst_12 {dimension_numbers = #tpu.dot_dimension_numbers<[1], [0], [0], [1], [0, 0, 1, 1], [], []>} : vector<8x16xf32>, vector<16x16xf32>, vector<8x16xf32> -> vector<8x16xf32>
    %cst_13 = arith.constant dense<0.000000e+00> : vector<8x8xf32>
    %12 = tpu.matmul %11, %1, %cst_13 {dimension_numbers = #tpu.dot_dimension_numbers<[1], [0], [0], [1], [0, 0, 1, 1], [], []>} : vector<8x16xf32>, vector<16x8xf32>, vector<8x8xf32> -> vector<8x8xf32>
    %c1_14 = arith.constant 1 : index
    %c0_15 = arith.constant 0 : index
    %c0_16 = arith.constant 0 : index
    %13 = vector.load %arg4[%c1_14, %c0_15, %c0_16] : memref<4x8x8xf32, #tpu.memory_space<vmem>>, vector<1x8x8xf32>
    %14 = vector.shape_cast %13 : vector<1x8x8xf32> to vector<8x8xf32>
    %15 = vector.shape_cast %12 : vector<8x8xf32> to vector<1x8x8xf32>
    tpu.vector_store %arg4[%c1_14, %c0_15, %c0_16], %15 {strides = array<i32>} : memref<4x8x8xf32, #tpu.memory_space<vmem>>, vector<1x8x8xf32>,
    %c2 = arith.constant 2 : index
    %c0_17 = arith.constant 0 : index
    %c0_18 = arith.constant 0 : index
    %16 = vector.load %arg3[%c2, %c0_17, %c0_18] : memref<4x16x16xf32, #tpu.memory_space<vmem>>, vector<1x16x16xf32>
    %17 = vector.shape_cast %16 : vector<1x16x16xf32> to vector<16x16xf32>
    %cst_19 = arith.constant dense<0.000000e+00> : vector<8x16xf32>
    %18 = tpu.matmul %0, %17, %cst_19 {dimension_numbers = #tpu.dot_dimension_numbers<[1], [0], [0], [1], [0, 0, 1, 1], [], []>} : vector<8x16xf32>, vector<16x16xf32>, vector<8x16xf32> -> vector<8x16xf32>
    %cst_20 = arith.constant dense<0.000000e+00> : vector<8x8xf32>
    %19 = tpu.matmul %18, %1, %cst_20 {dimension_numbers = #tpu.dot_dimension_numbers<[1], [0], [0], [1], [0, 0, 1, 1], [], []>} : vector<8x16xf32>, vector<16x8xf32>, vector<8x8xf32> -> vector<8x8xf32>
    %c2_21 = arith.constant 2 : index
    %c0_22 = arith.constant 0 : index
    %c0_23 = arith.constant 0 : index
    %20 = vector.load %arg4[%c2_21, %c0_22, %c0_23] : memref<4x8x8xf32, #tpu.memory_space<vmem>>, vector<1x8x8xf32>
    %21 = vector.shape_cast %20 : vector<1x8x8xf32> to vector<8x8xf32>
    %22 = vector.shape_cast %19 : vector<8x8xf32> to vector<1x8x8xf32>
    tpu.vector_store %arg4[%c2_21, %c0_22, %c0_23], %22 {strides = array<i32>} : memref<4x8x8xf32, #tpu.memory_space<vmem>>, vector<1x8x8xf32>,
    %c3 = arith.constant 3 : index
    %c0_24 = arith.constant 0 : index
    %c0_25 = arith.constant 0 : index
    %23 = vector.load %arg3[%c3, %c0_24, %c0_25] : memref<4x16x16xf32, #tpu.memory_space<vmem>>, vector<1x16x16xf32>
    %24 = vector.shape_cast %23 : vector<1x16x16xf32> to vector<16x16xf32>
    %cst_26 = arith.constant dense<0.000000e+00> : vector<8x16xf32>
    %25 = tpu.matmul %0, %24, %cst_26 {dimension_numbers = #tpu.dot_dimension_numbers<[1], [0], [0], [1], [0, 0, 1, 1], [], []>} : vector<8x16xf32>, vector<16x16xf32>, vector<8x16xf32> -> vector<8x16xf32>
    %cst_27 = arith.constant dense<0.000000e+00> : vector<8x8xf32>
    %26 = tpu.matmul %25, %1, %cst_27 {dimension_numbers = #tpu.dot_dimension_numbers<[1], [0], [0], [1], [0, 0, 1, 1], [], []>} : vector<8x16xf32>, vector<16x8xf32>, vector<8x8xf32> -> vector<8x8xf32>
    %c3_28 = arith.constant 3 : index
    %c0_29 = arith.constant 0 : index
    %c0_30 = arith.constant 0 : index
    %27 = vector.load %arg4[%c3_28, %c0_29, %c0_30] : memref<4x8x8xf32, #tpu.memory_space<vmem>>, vector<1x8x8xf32>
    %28 = vector.shape_cast %27 : vector<1x8x8xf32> to vector<8x8xf32>
    %29 = vector.shape_cast %26 : vector<8x8xf32> to vector<1x8x8xf32>
    tpu.vector_store %arg4[%c3_28, %c0_29, %c0_30], %29 {strides = array<i32>} : memref<4x8x8xf32, #tpu.memory_space<vmem>>, vector<1x8x8xf32>,
    return
  }
  func.func @transform_0(%arg0: i32) -> (i32, i32) {
    %c0_i32 = arith.constant 0 : i32
    %c0_i32_0 = arith.constant 0 : i32
    %c0_i32_1 = arith.constant 0 : i32
    return %c0_i32, %c0_i32_0 : i32, i32
  }
  func.func @transform_1(%arg0: i32) -> (i32, i32) {
    %c0_i32 = arith.constant 0 : i32
    %c0_i32_0 = arith.constant 0 : i32
    %c0_i32_1 = arith.constant 0 : i32
    return %c0_i32, %c0_i32_0 : i32, i32
  }
  func.func @transform_2(%arg0: i32) -> (i32, i32, i32) {
    %c0_i32 = arith.constant 0 : i32
    %c0_i32_0 = arith.constant 0 : i32
    %c0_i32_1 = arith.constant 0 : i32
    return %arg0, %c0_i32, %c0_i32_0 : i32, i32, i32
  }
  func.func @transform_3(%arg0: i32) -> (i32, i32, i32) {
    %c0_i32 = arith.constant 0 : i32
    %c0_i32_0 = arith.constant 0 : i32
    %c0_i32_1 = arith.constant 0 : i32
    return %arg0, %c0_i32, %c0_i32_0 : i32, i32, i32
  }
}

</mosaic_0001>

<bundles_post_ra>
// kernel: tpu_custom_call.1
= control target key start
LH: loop header
LB: loop body
LE: loop exit
PB: predicated region body
PF: predicated region fallthrough
CT: control target
= control target key end

     0   :  { %8 = vsyncpa [#allocation3], 0  ;;  %s1398_s0 = inlined_call_operand.vmem [shape: f32[8,16], index: 0, kind: input, shape index: {}]   ;;  %s1399_s1 = inlined_call_operand.vmem [shape: f32[16,8], index: 1, kind: input, shape index: {}]   ;;  %s1400_s2 = inlined_call_operand.hbm [shape: f32[8,16,16], index: 2, kind: input, shape index: {}]   ;;  %s1401_s3 = inlined_call_operand.hbm [shape: f32[8,8,8], index: 3, kind: output, shape index: {}]  }
   0x1   :  { %10 = vsyncpa [#allocation3 + $0x1], 0 }
   0x2   :  { %11 = vsyncpa [#allocation4], 0 }
   0x3   :  { %13 = vsyncpa [#allocation4 + $0x1], 0  ;;  %s1196_s12 = smov 0   ;;  %s1198_s13 = smov 0  }
   0x4   :  { %s1200_s14 = smov 0   ;;  %s1202_s15 = smov 0  }
   0x5 LB: > { %s1217_s16 = sadd.s32 4294967295, %s1165_s15   ;;  %s877_s17 = sadd.s32 4294967294, %s1165_s15   ;;  %s1165_s15 = sphi %s1202_s15, %s1414_s15   ;;  %s1161_s14 = sphi %s1200_s14, %s1413_s14   ;;  %s1157_s13 = sphi %s1198_s13, %s1412_s13   ;;  %s1153_s12 = sphi %s1196_s12, %s1411_s12  }
   0x6   : > { %s1221_s18 = sadd.s32 1, %s1165_s15   ;;  %s68_s19 = sadd.s32 1, %s1161_s14 }
   0x7   : > { %s65_s20 = ssub.s32 %s1165_s15, %s1221_s18  ;;  %p75_p0 = scmp.ne.s32.totalorder %s1161_s14, %s1157_s13 }
   0x8   : > { %p66_p1 = scmp.eq.s32.totalorder %s65_s20, 0  ;;  %p76_p2 = scmp.eq.s32.totalorder %s1165_s15, 0 }
   0x9   : > { %p81_p3 = scmp.ne.s32.totalorder %s1157_s13, %s1153_s12  ;;  %p82_p4 = scmp.eq.s32.totalorder %s1217_s16, 0 }
   0xa   : > { %s1233_s21 = scalar_select %p66_p1, %s1161_s14, %s68_s19  }
   0xb   : > { %p1235_p5 = por %p76_p2, %p75_p0  ;;  %p1239_p6 = por %p82_p4, %p81_p3 }
   0xc   : > { %p105_p7 = scmp.eq.s32.totalorder %s1217_s16, 1  ;;  %p111_p8 = scmp.eq.s32.totalorder %s877_s17, 1 }
   0xd   : > { %p1028_p10 = scmp.lt.s32.totalorder %s1165_s15, 2  ;;  %s137_s26 = sand.u32 1, %s1161_s14  }
   0xe   : > { %p1246_p11 = por %p105_p7, %p75_p0  ;;  %p1250_p12 = por %p111_p8, %p81_p3 }
   0xf   : > { %s910_s27 = sshll.u32 %s1165_s15, 10  ;;  %s880_s28 = sshll.u32 %s137_s26, 6 }
  0x10   : > { %s1405_s24 = scalar_select %p1246_p11, 1, 0 }
  0x11   : > { %s1406_s25 = scalar_select %p1250_p12, 1, 0 }
  0x12   : > { %s1259_s4 = scalar_lea.hbm %s1400_s2, %s910_s27  ;;  %s141_s5 = scalar_lea.vmem [#allocation2], %s880_s28 }
  0x13   : > { %s149_s6 = sshll.u32 %s141_s5, 4  ;;  %p1263_p13 = pnand %p1028_p10, %p1235_p5  ;;  %s1267_s6 = int_to_ptr.vmem [resolvable:$true] %s149_s6 }
  0x14   : > { %s1269_s8 = scalar_lea.sflag [#allocation3], %s137_s26  ;;  %s1069_s9 = scalar_lea.hbm %s1259_s4, 1024 }
  0x15   : > { %p1070_p0 = scmp.ne.s32.totalorder %s1259_s4, %s1069_s9  ;;  %p1071_p1 = pneg %p1263_p13 }
  0x16   : > { %s1074_s17 = scalar_lea.hbm %s1400_s2, 2048  ;;  %p1075_p4 = scmp.lt.u32.totalorder %s1259_s4, %s1400_s2 }
  0x17   : > { %p1072_p2 = pnand %p1071_p1, %p1070_p0  ;;  %p1076_p5 = scmp.lt.u32.totalorder %s1074_s17, %s1069_s9 }
  0x18   : > { %p1078_p8 = scmp.lt.u32.totalorder %s1069_s9, %s1259_s4 }
  0x19   : > { %p1073_p3 = pneg %p1072_p2  ;;  %p1077_p7 = por %p1076_p5, %p1075_p4 }
  0x1b   : > { %p1079_p10 = por %p1078_p8, %p1077_p7 }
  0x1d   : > { %p1080_p9 = pnand %p1079_p10, %p1073_p3 }
  0x1f   : > { %1083 = shalt.err (!%p1080_p9)
}
  0x20   : > { %s1084_s22 = scalar_lea.vmem %s1267_s6, 1024  ;;  %s1167_s26 = smov [#allocation2]  }
  0x21   : > { %p1085_p0 = scmp.ne.s32.totalorder %s1267_s6, %s1084_s22  ;;  %s1089_s27 = sshll.u32 %s1167_s26, 4  ;;  %s1090_s27 = int_to_ptr.vmem [resolvable:$false] %s1089_s27 }
  0x22   : > { %s1091_s28 = scalar_lea.vmem %s1090_s27, 2048  ;;  %p1092_p11 = scmp.lt.s32.totalorder %s1267_s6, %s1090_s27 }
  0x23   : > { %p1087_p2 = pnand %p1085_p0, %p1071_p1  ;;  %p1093_p4 = scmp.lt.s32.totalorder %s1091_s28, %s1084_s22 }
  0x25   : > { %p1088_p12 = pneg %p1087_p2  ;;  %p1094_p5 = por %p1093_p4, %p1092_p11 }
  0x27   : > { %p1095_p7 = pnand %p1094_p5, %p1088_p12 }
  0x29   : > { %1098 = shalt.err (!%p1095_p7)
}
  0x2a   : > { %s1168_s29 = smov 128   ;;  %s1169_s30 = smov 8  }
  0x2b   : > { %1023 = dma.hbm_to_vmem [thread:$0]  (!%p1263_p13), %s1259_s4, 1024, %s1267_s6, %s1269_s8, %s1168_s29, %s1168_s29, %s1169_s30  }
  0x2c   : > { %p884_p9 = scmp.ge.s32.totalorder %s1165_s15, 1  ;;  %p157_p1 = scmp.lt.s32.totalorder %s1165_s15, 3 }
  0x2e   : > { %p158_p3 = pnand %p884_p9, %p157_p1 }
  0x2f   : > { %s1300_s5 = sand.u32 (!%p158_p3), 1, %s1157_s13  }
  0x30   : > { %161 = sbr.rel (%p158_p3) target bundleno = 513 (0x201), region = 32  ;;  %s885_s9 = sshll.u32 (!%p158_p3), %s1300_s5, 6 }
  0x31   : > { %s164_s10 = scalar_lea.sflag (!%p158_p3), [#allocation3], %s1300_s5  ;;  %s1304_s11 = scalar_lea.vmem (!%p158_p3), [#allocation2], %s885_s9 }
  0x37   : > { %1144 = dma.done.wait (%p1239_p6), %s164_s10, 1024  }
  0x38   : > { %1146 = vsyncadd (%p1239_p6), %s164_s10, 4294966272  ;;  %v1170_v0 = vmov 0.0|0.0   ;;  %vm1171_vm0 = vmmov 0   ;;  %v1172_v1 = vmov 0.0   ;;  %v195_v2 = vld [vmem:[%s1304_s11] sm:$0xff]  ;;  %v196_v3 = vld [vmem:[%s1304_s11 + $0x8] sm:$0xff] }
  0x39   : > { %992 = vmatprep.subr.bf16.mxu0 %v1170_v0  ;;  %940 = vmatprep.mubr.msk.f32.mxu0 %vm1171_vm0, %v1172_v1  ;;  %v993_v4 = vpack.c.bf16 %v196_v3, %v195_v2  ;;  %v889_v5 = vld [vmem:[%s1304_s11 + $0x10] sm:$0xff]  ;;  %v890_v6 = vld [vmem:[%s1304_s11 + $0x18] sm:$0xff]  ;;  %v192_v7 = vld [vmem:[%s1398_s0] sm:$0xff]  ;;  %vm197_vm1 = vcmask 130048   ;;  %s886_s19 = sshll.u32 %s1300_s5, 5  ;;  %vm344_vm2 = vcmask 64512  }
  0x3a   : > { %995 = vmatprep.subr.bf16.mxu1 %v1170_v0  ;;  %947 = vmatprep.mubr.msk.f32.mxu1 %vm1171_vm0, %v1172_v1  ;;  %v999_v8 = vpack.c.bf16 %v890_v6, %v889_v5  ;;  %v193_v9 = vld [vmem:[%s1399_s1] sm:$0xff]  ;;  %v194_v10 = vld [vmem:[%s1399_s1 + $0x8] sm:$0xff]  ;;  %v899_v15 = vld [vmem:[%s1304_s11 + $0x30] sm:$0xff]  ;;  %s189_s20 = scalar_lea.vmem [#allocation5], %s886_s19  ;;  %s911_s26 = sshll.u32 %s1217_s16, 9 }
  0x3b   : > { %994 = vmatpush3.bf16.msra.mxu0 %v993_v4  ;;  %v894_v11 = vld [vmem:[%s1304_s11 + $0x20] sm:$0xff]  ;;  %v895_v12 = vld [vmem:[%s1304_s11 + $0x28] sm:$0xff]  ;;  %v996_v13 = vpack.c.bf16 %v194_v10, %v193_v9  ;;  %v900_v16 = vld [vmem:[%s1304_s11 + $0x38] sm:$0xff]  ;;  %s804_s22 = sshll.u32 %s189_s20, 4  ;;  %s1353_s29 = scalar_lea.hbm %s1401_s3, %s911_s26  ;;  %s1347_s22 = int_to_ptr.vmem [resolvable:$true] %s804_s22 }
  0x3c   : > { %998 = vmatprep.subr.bf16.mxu0 %v1170_v0  ;;  %v1005_v14 = vpack.c.bf16 %v895_v12, %v894_v11  ;;  %v1011_v17 = vpack.c.bf16 %v900_v16, %v899_v15  ;;  %s791_s30 = scalar_lea.sflag [#allocation4], %s1300_s5  ;;  %s1099_s16 = scalar_lea.vmem %s1347_s22, 512 }
  0x3d   : > { %997 = vmatpush3.bf16.msra.mxu1 %v996_v13  ;;  %p1100_p6 = scmp.ne.s32.totalorder %s1347_s22, %s1099_s16  ;;  %p1408_p11 = scmp.ne.s32.totalorder %s1405_s24, 0 }
  0x3e   : > { %941 = vmatmul.mubr.msk.f32.vlgmr.msra.gmra.mrb[0].mxu0 %vm197_vm1, %v192_v7  ;;  %1001 = vmatprep.subr.bf16.mxu1 %v1170_v0  ;;  %s1173_s9 = smov [#allocation5]  }
  0x3f   : > { %1000 = vmatpush3.bf16.msra.mxu0 %v999_v8  ;;  %954 = vmatprep.mubr.msk.f32.mxu0 %vm1171_vm0, %v1172_v1  ;;  %p1101_p12 = pnand %p1100_p6, %p1408_p11  ;;  %s1103_s10 = sshll.u32 %s1173_s9, 4  ;;  %s1104_s10 = int_to_ptr.vmem [resolvable:$false] %s1103_s10 }
  0x40   : > { %1004 = vmatprep.subr.bf16.mxu0 %v1170_v0  ;;  %s1105_s11 = scalar_lea.vmem %s1104_s10, 1024  ;;  %p1106_p8 = scmp.lt.s32.totalorder %s1347_s22, %s1104_s10 }
  0x41   : > { %p1102_p13 = pneg %p1101_p12  ;;  %p1107_p10 = scmp.lt.s32.totalorder %s1105_s11, %s1099_s16 }
  0x42   : > { %955 = vmatmul.mubr.msk.f32.vlgmr.msra.gmra.mrb[2].mxu0 %vm197_vm1, %v192_v7 }
  0x43   : > { %1006 = vmatpush3.bf16.msra.mxu0 %v1005_v14  ;;  %968 = vmatprep.mubr.msk.f32.mxu0 %vm1171_vm0, %v1172_v1  ;;  %p1108_p0 = por %p1107_p10, %p1106_p8 }
  0x44   : > { %1010 = vmatprep.subr.bf16.mxu0 %v1170_v0 }
  0x45   : > { %p1109_p2 = pnand %p1108_p0, %p1102_p13 }
  0x46   : > { %969 = vmatmul.mubr.msk.f32.vlgmr.msra.gmra.mrb[4].mxu0 %vm197_vm1, %v192_v7 }
  0x47   : > { %1012 = vmatpush3.bf16.msra.mxu0 %v1011_v17  ;;  %982 = vmatprep.mubr.msk.f32.mxu0 %vm1171_vm0, %v1172_v1 }
  0x4a   : > { %983 = vmatmul.mubr.msk.f32.vlgmr.msra.gmra.mrb[6].mxu0 %vm197_vm1, %v192_v7 }
 0x111   : > { %v267_v18 = vpop.f32.mrb[0].mxu0 }
 0x112   : > { %v942_v19 = vpop.f32.mrb[1].mxu0  ;;  %948 = vmatmul.mubr.msk.f32.vlgmr.msra.gmra.mrb[0].mxu1 %vm197_vm1, %v267_v18 }
 0x113   : > { %1003 = vmatpush3.bf16.msra.mxu1 %v996_v13  ;;  %961 = vmatprep.mubr.msk.f32.mxu1 %vm1171_vm0, %v1172_v1 }
 0x114   : > { %1007 = vmatprep.subr.bf16.mxu1 %v1170_v0 }
 0x115   : > { %v415_v20 = vpop.f32.mrb[2].mxu0 }
 0x116   : > { %v956_v21 = vpop.f32.mrb[3].mxu0  ;;  %962 = vmatmul.mubr.msk.f32.vlgmr.msra.gmra.mrb[2].mxu1 %vm197_vm1, %v415_v20 }
 0x117   : > { %1009 = vmatpush3.bf16.msra.mxu1 %v996_v13  ;;  %975 = vmatprep.mubr.msk.f32.mxu1 %vm1171_vm0, %v1172_v1 }
 0x118   : > { %1013 = vmatprep.subr.bf16.mxu1 %v1170_v0 }
 0x119   : > { %v563_v22 = vpop.f32.mrb[4].mxu0 }
 0x11a   : > { %v970_v23 = vpop.f32.mrb[5].mxu0  ;;  %976 = vmatmul.mubr.msk.f32.vlgmr.msra.gmra.mrb[4].mxu1 %vm197_vm1, %v563_v22 }
 0x11b   : > { %1015 = vmatpush3.bf16.msra.mxu1 %v996_v13  ;;  %989 = vmatprep.mubr.msk.f32.mxu1 %vm1171_vm0, %v1172_v1 }
 0x11d   : > { %v711_v24 = vpop.f32.mrb[6].mxu0 }
 0x11e   : > { %v984_v25 = vpop.f32.mrb[7].mxu0  ;;  %990 = vmatmul.mubr.msk.f32.vlgmr.msra.gmra.mrb[6].mxu1 %vm197_vm1, %v711_v24 }
 0x1e5   : > { %v340_v26 = vpop.f32.mrb[0].mxu1 }
 0x1e6   : > { %345 = vst.msk [vmem:[%s189_s20] sm:$0xff] %vm344_vm2, %v340_v26  ;;  %v949_v27 = vpop.f32.mrb[1].mxu1 }
 0x1e9   : > { %v488_v28 = vpop.f32.mrb[2].mxu1 }
 0x1ea   : > { %893 = vst.msk [vmem:[%s189_s20 + $0x8] sm:$0xff] %vm344_vm2, %v488_v28  ;;  %v963_v29 = vpop.f32.mrb[3].mxu1 }
 0x1ed   : > { %v636_v30 = vpop.f32.mrb[4].mxu1 }
 0x1ee   : > { %898 = vst.msk [vmem:[%s189_s20 + $0x10] sm:$0xff] %vm344_vm2, %v636_v30  ;;  %v977_v31 = vpop.f32.mrb[5].mxu1 }
 0x1f1   : > { %v784_v32 = vpop.f32.mrb[6].mxu1 }
 0x1f2   : > { %903 = vst.msk [vmem:[%s189_s20 + $0x18] sm:$0xff] %vm344_vm2, %v784_v32  ;;  %v991_v33 = vpop.f32.mrb[7].mxu1 }
 0x1f3   : > { %1112 = shalt.err (!%p1109_p2)
}
 0x1f4   : > { %s1113_s23 = scalar_lea.hbm %s1353_s29, 512  ;;  %s1117_s7 = scalar_lea.hbm %s1401_s3, 1024 }
 0x1f5   : > { %p1114_p4 = scmp.ne.s32.totalorder %s1353_s29, %s1113_s23  ;;  %p1118_p9 = scmp.lt.u32.totalorder %s1353_s29, %s1401_s3 }
 0x1f6   : > { %p1119_p1 = scmp.lt.u32.totalorder %s1117_s7, %s1113_s23  ;;  %p1121_p6 = scmp.lt.u32.totalorder %s1113_s23, %s1353_s29 }
 0x1f7   : > { %p1115_p5 = pnand %p1114_p4, %p1408_p11 }
 0x1f8   : > { %p1120_p3 = por %p1119_p1, %p1118_p9 }
 0x1f9   : > { %p1116_p7 = pneg %p1115_p5 }
 0x1fa   : > { %p1122_p12 = por %p1121_p6, %p1120_p3 }
 0x1fc   : > { %p1123_p13 = pnand %p1122_p12, %p1116_p7 }
 0x1fe   : > { %1126 = shalt.err (!%p1123_p13)
}
 0x1ff   : > { %s1174_s19 = smov 128   ;;  %s1175_s20 = smov 8  }
 0x200   : > { %1018 = dma.vmem_to_hbm [thread:$0]  (%p1408_p11), %s1347_s22, 512, %s1353_s29, %s791_s30, %s1174_s19, %s1174_s19, %s1175_s20  }
 0x201 PF: > { %s819_s26 = sand.u32 1, %s1153_s12   ;;  %p1409_p8 = scmp.ne.s32.totalorder %s1406_s25, 0 }
 0x202   : > { %p1410_p10 = scmp.ge.s32.totalorder %s1165_s15, 2  ;;  %s820_s27 = scalar_lea.sflag [#allocation4], %s819_s26 }
 0x204   : > { %p1025_p0 = pnand %p1410_p10, %p1409_p8 }
 0x206   : > { %1148 = dma.done.wait (!%p1025_p0), %s820_s27, 512  }
 0x207   : > { %1150 = vsyncadd (!%p1025_p0), %s820_s27, 4294966784  ;;  %p16_p2 = scmp.ge.s32.totalorder %s1221_s18, 4   ;;  %s1411_s12 = smov %s1157_s13 }
 0x208   : > { %s1412_s13 = smov %s1161_s14  ;;  %s1413_s14 = smov %s1233_s21 }
 0x209   : > { %s1414_s15 = smov %s1221_s18  ;;  %18 = sbr.rel (!%p16_p2) target bundleno = 5 (0x5), region = 83 }
 0x210   :  { %825 = vsyncpa [#allocation3], 1 }
 0x211   :  { %827 = vsyncpa [#allocation3 + $0x1], 1 }
 0x212   :  { %828 = vsyncpa [#allocation4], 1 }
 0x213   :  { %830 = vsyncpa [#allocation4 + $0x1], 1 }

</bundles_post_ra>
